<compile_context>
chip_gen: v6e
topology: v6e:2x2x1
jax: 0.10.0
libtpu: 0.0.40
codegen_flags: <defaults>
</compile_context>

<pallas_src>
import functools

import jax
import jax.numpy as jnp
from jax.experimental import pallas as pl
from jax.experimental.pallas import tpu as pltpu

N_KNOTS = 5              # spline_complexity
N_INT = N_KNOTS - 1      # number of spline intervals
N_CH = 7                 # 3 lin + 3 ang + 1 grasp
C_PAD = 8                # channels padded to one sublane group
COEF_W = 8               # packed coefficient plane width (a0,b0,c0,d0,e1,e2,e3,pad)
MAX_T = 1.0
MAX_BLOCK_T = 2048       # query-time tile cap (lane dim); overhead-dominated kernel


# ----------------------------------------------------------------------------
# Glue: natural cubic spline coefficients (torchcubicspline algebra, fp32).
# ----------------------------------------------------------------------------
def fit_system_inverse(knots):
    """Inverse of the (knot-only) 5x5 tridiagonal system for knot derivatives."""
    n = knots.shape[0]
    h = knots[1:] - knots[:-1]
    hr = 1.0 / h
    diag = (jnp.zeros((n,), jnp.float32).at[:-1].add(hr).at[1:].add(hr)) * 2.0
    A = jnp.diag(diag) + jnp.diag(hr, 1) + jnp.diag(hr, -1)
    return jnp.linalg.inv(A)


def natural_cubic_coeffs(knots, y, a_inv):
    """knots: [n]; y: [n, C]; a_inv: [n, n]. Returns a, b, c, d each [C, n-1]
    such that spline(t) = a + f*b + f^2*c + f^3*d with f = t - knots[idx]."""
    x = y.T.astype(jnp.float32)                # [C, n]
    n = knots.shape[0]
    h = knots[1:] - knots[:-1]                 # [n-1]
    hr = 1.0 / h
    hr2 = hr * hr
    three_pd = 3.0 * (x[:, 1:] - x[:, :-1])    # [C, n-1]
    six_pd = 2.0 * three_pd
    pd_scaled = three_pd * hr2

    rhs = (jnp.zeros((x.shape[0], n), jnp.float32)
           .at[:, :-1].add(pd_scaled).at[:, 1:].add(pd_scaled))
    kder = rhs @ a_inv.T                       # knot derivatives [C, n]

    a = x[:, :-1]
    b = kder[:, :-1]
    two_c = (six_pd * hr - 4.0 * kder[:, :-1] - 2.0 * kder[:, 1:]) * hr
    three_d = (-six_pd * hr + 3.0 * (kder[:, :-1] + kder[:, 1:])) * hr2
    return a, b, 0.5 * two_c, three_d / 3.0


def pack_truncated_power_coeffs(a, b, c, d):
    """[C, N_INT] x4 -> [8, 8] plane: columns a0|b0|c0|d0|e1|e2|e3 (+pad).

    Truncated-power form of the piecewise cubic:
        S(t) = a0 + b0*f + c0*f^2 + d0*f^3 + sum_{k=1}^{N_INT-1} e_k*max(t-knot_k,0)^3
    with f = t - knot_0 and e_k = d_k - d_{k-1} (C2 continuity => the polynomial
    jump at interior knot k is a pure cubic in (t - knot_k))."""
    e = d[:, 1:] - d[:, :-1]                                     # [C, N_INT-1]
    packed = jnp.concatenate([a[:, :1], b[:, :1], c[:, :1], d[:, :1], e],
                             axis=1).astype(jnp.float32)         # [7, 7]
    return (jnp.zeros((C_PAD, COEF_W), jnp.float32)
            .at[:N_CH, :4 + N_INT - 1].set(packed))


# ----------------------------------------------------------------------------
# Pallas kernel: spline evaluation + range masking.
# ----------------------------------------------------------------------------
def spline_eval_kernel(knots_ref, t_ref, coef_ref, out_ref):
    tv = t_ref[...]                              # [1, BT] query times
    t0 = knots_ref[0]
    t_last = knots_ref[N_KNOTS - 1]
    tc = jnp.clip(tv, t0, t_last)                # torch.clamp(t, min=t0, max=tN)
    # out-of-range mask on the original, unclamped times
    inside = jnp.logical_and(tv >= t0, tv <= t_last).astype(jnp.float32)

    coef = coef_ref[...]                         # [8, 8], loaded once per block
    a0 = coef[:, 0:1]
    b0 = coef[:, 1:2]
    c0 = coef[:, 2:3]
    d0 = coef[:, 3:4]

    f0 = tc - t0                                 # [1, BT]
    # base cubic of interval 0, expanded about knot 0 (Horner)
    val = a0 + f0 * (b0 + f0 * (c0 + f0 * d0))   # [8, BT]
    # truncated-power corrections at the interior knots
    for k in range(1, N_INT):
        r = jnp.maximum(tc - knots_ref[k], 0.0)  # [1, BT] (cheap)
        r3 = r * r * r                           # [1, BT] (cheap)
        val = val + coef[:, 3 + k:4 + k] * r3    # e_k broadcast-mul-add [8, BT]

    out_ref[...] = val * inside                  # zero outside [t0, t_last]


def spline_evaluate(t_query, knots, coef):
    """t_query: [T] -> [8, Tp] channel-major spline values (padded channels/time).
    Values are zeroed where t is outside [knots[0], knots[-1]]."""
    T = t_query.shape[0]
    # Big lane tiles (overhead-dominated kernel); single block for small T,
    # >=2 "parallel" blocks for large T so v7x's two TensorCores both work.
    block_t = min(MAX_BLOCK_T, pl.cdiv(T, 128) * 128)
    n_blk = pl.cdiv(T, block_t)
    Tp = n_blk * block_t
    t2 = jnp.zeros((1, Tp), jnp.float32).at[0, :T].set(t_query.astype(jnp.float32))

    # TODO(synk): the grid-invariant coefficient input could use
    # pipeline_mode=pl.Buffered(1); negligible here (8x8 f32), left default.
    out = pl.pallas_call(
        spline_eval_kernel,
        out_shape=jax.ShapeDtypeStruct((C_PAD, Tp), jnp.float32),
        grid_spec=pltpu.PrefetchScalarGridSpec(
            num_scalar_prefetch=0,
            grid=(n_blk,),
            in_specs=[
                pl.BlockSpec(memory_space=pltpu.MemorySpace.SMEM),     # knots [5]
                pl.BlockSpec((1, block_t), lambda i: (0, i)),          # t
                pl.BlockSpec((C_PAD, COEF_W), lambda i: (0, 0)),       # coeff plane
            ],
            out_specs=pl.BlockSpec((C_PAD, block_t), lambda i: (0, i)),
        ),
        compiler_params=pltpu.CompilerParams(
            dimension_semantics=("parallel",)),
    )(knots, t2, coef)
    return out                                                         # [8, Tp]


# ----------------------------------------------------------------------------
# HandSpline (velocities path)
# ----------------------------------------------------------------------------
class HandSplinePallas:
    def __init__(self, key, spline_complexity=N_KNOTS, max_t=MAX_T):
        n = spline_complexity
        self.spline_t = jnp.linspace(0.0, max_t, n, dtype=jnp.float32)
        # init_vel_lin/ang/grasp default: 0.01 * randn   (fp32; PyTorch was fp64)
        self.spline_y = 0.01 * jax.random.normal(key, (n, N_CH), dtype=jnp.float32)
        # fit matrix depends only on the fixed knot grid -> invert once here
        self.fit_a_inv = fit_system_inverse(self.spline_t)
        # unused by velocities(); kept for parity with the module's __init__
        self.grasp0 = jnp.zeros((1,), jnp.float32)
        self.pos0 = jnp.zeros((3,), jnp.float32)
        self.rot6d0 = jnp.array([1.0, 0.0, 0.0, 0.0, 1.0, 0.0], jnp.float32)
        # TODO(synk): forward() in the reference raises NotImplemented; rot0 /
        # rotation_6d_to_matrix and the static init helpers are host-side glue
        # and not part of the hot path.

    @functools.partial(jax.jit, static_argnums=0)
    def velocities(self, t):
        """Matches the PyTorch API: returns ([T,3] lin, [T,3] ang, [T,1] grasp)."""
        out = self._velocities_channel_major(t)                # [8, Tp]
        T = t.shape[0]
        # transpose only the thin channel slices (kernel output stays lane-dense)
        return out[0:3, :T].T, out[3:6, :T].T, out[6:7, :T].T

    @functools.partial(jax.jit, static_argnums=0)
    def velocities_channel_major(self, t):
        """[7, T] channel-major output for consumers that can skip the transpose."""
        return self._velocities_channel_major(t)[:N_CH, :t.shape[0]]

    def _velocities_channel_major(self, t):
        a, b, c, d = natural_cubic_coeffs(self.spline_t, self.spline_y,
                                          self.fit_a_inv)
        coef = pack_truncated_power_coeffs(a, b, c, d)         # [8, 8]
        return spline_evaluate(t, self.spline_t, coef)         # [8, Tp]


# pure-JAX reference for correctness.
# NOTE: shares the coefficient fit with the kernel path, but evaluates with an
# independent per-interval Horner (searchsorted), so it validates both the
# truncated-power conversion and the Pallas evaluation kernel.
def velocities_ref(t, knots, y):
    a_inv = fit_system_inverse(knots)
    a, b, c, d = natural_cubic_coeffs(knots, y, a_inv)         # each [7, N_INT]
    tc = jnp.clip(t, knots[0], knots[-1])
    idx = jnp.clip(jnp.searchsorted(knots, tc, side="left") - 1, 0, N_INT - 1)
    f = tc - knots[idx]
    val = a[:, idx] + f * (b[:, idx] + f * (c[:, idx] + f * d[:, idx]))  # [7, T]
    inside = ((t >= knots[0]) & (t <= knots[-1])).astype(val.dtype)
    out = (val * inside).T
    return out[..., :3], out[..., 3:6], out[..., 6:]


if __name__ == "__main__":
    key = jax.random.PRNGKey(0)
    k_param, k_t1, k_t2 = jax.random.split(key, 3)

    model = HandSplinePallas(k_param)

    # small query including out-of-range points (exercise the zero-mask path)
    T = 200
    t = jax.random.uniform(k_t1, (T,), jnp.float32, minval=-0.2, maxval=1.2)

    lin, ang, grasp = model.velocities(t)
    jax.block_until_ready((lin, ang, grasp))

    lin_r, ang_r, grasp_r = velocities_ref(t, model.spline_t, model.spline_y)
    assert lin.shape == (T, 3) and ang.shape == (T, 3) and grasp.shape == (T, 1)
    for got, ref in ((lin, lin_r), (ang, ang_r), (grasp, grasp_r)):
        assert jnp.allclose(got, ref, atol=1e-5, rtol=1e-5), \
            float(jnp.max(jnp.abs(got - ref)))

    # larger query: exercises the multi-block ("parallel" grid) path
    T2 = 2500
    t_big = jax.random.uniform(k_t2, (T2,), jnp.float32, minval=-0.2, maxval=1.2)
    lin2, ang2, grasp2 = model.velocities(t_big)
    jax.block_until_ready((lin2, ang2, grasp2))
    lin2_r, ang2_r, grasp2_r = velocities_ref(t_big, model.spline_t, model.spline_y)
    for got, ref in ((lin2, lin2_r), (ang2, ang2_r), (grasp2, grasp2_r)):
        assert jnp.allclose(got, ref, atol=1e-5, rtol=1e-5), \
            float(jnp.max(jnp.abs(got - ref)))

    print("KERNEL_OK")
</pallas_src>

<mosaic_0001>
module attributes {stable_mosaic.version = 11 : i64} {
  func.func @spline_eval_kernel(%arg0: i32, %arg1: memref<5xf32, #tpu.memory_space<smem>>, %arg2: memref<1x256xf32, #tpu.memory_space<vmem>>, %arg3: memref<8x8xf32, #tpu.memory_space<vmem>>, %arg4: memref<8x256xf32, #tpu.memory_space<vmem>>) attributes {dimension_semantics = [#tpu.dimension_semantics<parallel>], iteration_bounds = array<i64: 1>, scalar_prefetch = 0 : i64, scratch_operands = 0 : i64, tpu.core_type = #tpu.core_type<tc>, window_params = [{transform_indices = @transform_0, window_bounds = array<i64: 5>}, {transform_indices = @transform_1, window_bounds = array<i64: 1, 256>}, {pipeline_mode = #tpu.pipeline_mode<synchronous>, transform_indices = @transform_2, window_bounds = array<i64: 8, 8>}, {transform_indices = @transform_3, window_bounds = array<i64: 8, 256>}]} {
    %c0 = arith.constant 0 : index
    %c0_0 = arith.constant 0 : index
    %0 = vector.load %arg2[%c0, %c0_0] : memref<1x256xf32, #tpu.memory_space<vmem>>, vector<1x256xf32>
    %c0_1 = arith.constant 0 : index
    %1 = memref.load %arg1[%c0_1] : memref<5xf32, #tpu.memory_space<smem>>
    %c4 = arith.constant 4 : index
    %2 = memref.load %arg1[%c4] : memref<5xf32, #tpu.memory_space<smem>>
    %3 = vector.broadcast %1 : f32 to vector<1x256xf32>
    %4 = arith.maximumf %3, %0 : vector<1x256xf32>
    %5 = vector.broadcast %2 : f32 to vector<1x256xf32>
    %6 = arith.minimumf %5, %4 : vector<1x256xf32>
    %7 = vector.broadcast %1 : f32 to vector<1x256xf32>
    %8 = arith.cmpf oge, %0, %7 : vector<1x256xf32>
    %9 = vector.broadcast %2 : f32 to vector<1x256xf32>
    %10 = arith.cmpf ole, %0, %9 : vector<1x256xf32>
    %11 = arith.andi %8, %10 : vector<1x256xi1>
    %12 = arith.extui %11 : vector<1x256xi1> to vector<1x256xi32>
    %13 = arith.sitofp %12 : vector<1x256xi32> to vector<1x256xf32>
    %c0_2 = arith.constant 0 : index
    %c0_3 = arith.constant 0 : index
    %14 = vector.load %arg3[%c0_2, %c0_3] : memref<8x8xf32, #tpu.memory_space<vmem>>, vector<8x8xf32>
    %15 = vector.extract_strided_slice %14 {offsets = [0, 0], sizes = [8, 1], strides = [1, 1]} : vector<8x8xf32> to vector<8x1xf32>
    %16 = vector.extract_strided_slice %14 {offsets = [0, 1], sizes = [8, 1], strides = [1, 1]} : vector<8x8xf32> to vector<8x1xf32>
    %17 = vector.extract_strided_slice %14 {offsets = [0, 2], sizes = [8, 1], strides = [1, 1]} : vector<8x8xf32> to vector<8x1xf32>
    %18 = vector.extract_strided_slice %14 {offsets = [0, 3], sizes = [8, 1], strides = [1, 1]} : vector<8x8xf32> to vector<8x1xf32>
    %19 = vector.broadcast %1 : f32 to vector<1x256xf32>
    %20 = arith.subf %6, %19 : vector<1x256xf32>
    %21 = vector.broadcast %20 : vector<1x256xf32> to vector<8x256xf32>
    %22 = vector.broadcast %18 : vector<8x1xf32> to vector<8x256xf32>
    %23 = arith.mulf %21, %22 : vector<8x256xf32>
    %24 = vector.broadcast %17 : vector<8x1xf32> to vector<8x256xf32>
    %25 = arith.addf %24, %23 : vector<8x256xf32>
    %26 = vector.broadcast %20 : vector<1x256xf32> to vector<8x256xf32>
    %27 = arith.mulf %26, %25 : vector<8x256xf32>
    %28 = vector.broadcast %16 : vector<8x1xf32> to vector<8x256xf32>
    %29 = arith.addf %28, %27 : vector<8x256xf32>
    %30 = vector.broadcast %20 : vector<1x256xf32> to vector<8x256xf32>
    %31 = arith.mulf %30, %29 : vector<8x256xf32>
    %32 = vector.broadcast %15 : vector<8x1xf32> to vector<8x256xf32>
    %33 = arith.addf %32, %31 : vector<8x256xf32>
    %c1 = arith.constant 1 : index
    %34 = memref.load %arg1[%c1] : memref<5xf32, #tpu.memory_space<smem>>
    %35 = vector.broadcast %34 : f32 to vector<1x256xf32>
    %36 = arith.subf %6, %35 : vector<1x256xf32>
    %cst = arith.constant 0.000000e+00 : f32
    %37 = vector.broadcast %cst : f32 to vector<1x256xf32>
    %38 = arith.maximumf %36, %37 : vector<1x256xf32>
    %39 = arith.mulf %38, %38 : vector<1x256xf32>
    %40 = arith.mulf %39, %38 : vector<1x256xf32>
    %41 = vector.extract_strided_slice %14 {offsets = [0, 4], sizes = [8, 1], strides = [1, 1]} : vector<8x8xf32> to vector<8x1xf32>
    %42 = vector.broadcast %41 : vector<8x1xf32> to vector<8x256xf32>
    %43 = vector.broadcast %40 : vector<1x256xf32> to vector<8x256xf32>
    %44 = arith.mulf %42, %43 : vector<8x256xf32>
    %45 = arith.addf %33, %44 : vector<8x256xf32>
    %c2 = arith.constant 2 : index
    %46 = memref.load %arg1[%c2] : memref<5xf32, #tpu.memory_space<smem>>
    %47 = vector.broadcast %46 : f32 to vector<1x256xf32>
    %48 = arith.subf %6, %47 : vector<1x256xf32>
    %cst_4 = arith.constant 0.000000e+00 : f32
    %49 = vector.broadcast %cst_4 : f32 to vector<1x256xf32>
    %50 = arith.maximumf %48, %49 : vector<1x256xf32>
    %51 = arith.mulf %50, %50 : vector<1x256xf32>
    %52 = arith.mulf %51, %50 : vector<1x256xf32>
    %53 = vector.extract_strided_slice %14 {offsets = [0, 5], sizes = [8, 1], strides = [1, 1]} : vector<8x8xf32> to vector<8x1xf32>
    %54 = vector.broadcast %53 : vector<8x1xf32> to vector<8x256xf32>
    %55 = vector.broadcast %52 : vector<1x256xf32> to vector<8x256xf32>
    %56 = arith.mulf %54, %55 : vector<8x256xf32>
    %57 = arith.addf %45, %56 : vector<8x256xf32>
    %c3 = arith.constant 3 : index
    %58 = memref.load %arg1[%c3] : memref<5xf32, #tpu.memory_space<smem>>
    %59 = vector.broadcast %58 : f32 to vector<1x256xf32>
    %60 = arith.subf %6, %59 : vector<1x256xf32>
    %cst_5 = arith.constant 0.000000e+00 : f32
    %61 = vector.broadcast %cst_5 : f32 to vector<1x256xf32>
    %62 = arith.maximumf %60, %61 : vector<1x256xf32>
    %63 = arith.mulf %62, %62 : vector<1x256xf32>
    %64 = arith.mulf %63, %62 : vector<1x256xf32>
    %65 = vector.extract_strided_slice %14 {offsets = [0, 6], sizes = [8, 1], strides = [1, 1]} : vector<8x8xf32> to vector<8x1xf32>
    %66 = vector.broadcast %65 : vector<8x1xf32> to vector<8x256xf32>
    %67 = vector.broadcast %64 : vector<1x256xf32> to vector<8x256xf32>
    %68 = arith.mulf %66, %67 : vector<8x256xf32>
    %69 = arith.addf %57, %68 : vector<8x256xf32>
    %70 = vector.broadcast %13 : vector<1x256xf32> to vector<8x256xf32>
    %71 = arith.mulf %69, %70 : vector<8x256xf32>
    %c0_6 = arith.constant 0 : index
    %c0_7 = arith.constant 0 : index
    %72 = vector.load %arg4[%c0_6, %c0_7] : memref<8x256xf32, #tpu.memory_space<vmem>>, vector<8x256xf32>
    tpu.vector_store %arg4[%c0_6, %c0_7], %71 {strides = array<i32>} : memref<8x256xf32, #tpu.memory_space<vmem>>, vector<8x256xf32>,
    return
  }
  func.func @transform_0(%arg0: i32) -> i32 {
    %c0_i32 = arith.constant 0 : i32
    %c0_i32_0 = arith.constant 0 : i32
    return %c0_i32 : i32
  }
  func.func @transform_1(%arg0: i32) -> (i32, i32) {
    %c0_i32 = arith.constant 0 : i32
    %c0_i32_0 = arith.constant 0 : i32
    return %c0_i32, %arg0 : i32, i32
  }
  func.func @transform_2(%arg0: i32) -> (i32, i32) {
    %c0_i32 = arith.constant 0 : i32
    %c0_i32_0 = arith.constant 0 : i32
    %c0_i32_1 = arith.constant 0 : i32
    return %c0_i32, %c0_i32_0 : i32, i32
  }
  func.func @transform_3(%arg0: i32) -> (i32, i32) {
    %c0_i32 = arith.constant 0 : i32
    %c0_i32_0 = arith.constant 0 : i32
    return %c0_i32, %arg0 : i32, i32
  }
}

</mosaic_0001>

<bundles_post_ra>
// kernel: velocities.1
= control target key start
LH: loop header
LB: loop body
LE: loop exit
PB: predicated region body
PF: predicated region fallthrough
CT: control target
= control target key end

     0   :  { %8 = vsyncpa [#allocation3], 0  ;;  %s259_s0 = inlined_call_operand.vmem [shape: f32[5], index: 0, kind: input, shape index: {}]   ;;  %s260_s1 = inlined_call_operand.vmem [shape: f32[1,256], index: 1, kind: input, shape index: {}]   ;;  %s261_s2 = inlined_call_operand.vmem [shape: f32[8,8], index: 2, kind: input, shape index: {}]   ;;  %s262_s3 = inlined_call_operand.vmem [shape: f32[8,256], index: 3, kind: output, shape index: {}]  }
   0x1   :  { %s15_s14 = sshll.u32 %s259_s0, 4  ;;  %s16_s14 = int_to_ptr.vmem [resolvable:$true] %s15_s14 }
   0x2   :  { %s198_s15 = scalar_lea.vmem %s16_s14, 16  ;;  %p203_p1 = scmp.lt.s32.totalorder %s16_s14, %s16_s14 }
   0x3   :  { %p199_p0 = scmp.ne.s32.totalorder %s16_s14, %s198_s15  ;;  %p204_p2 = scmp.lt.s32.totalorder %s198_s15, %s198_s15 }
   0x5   :  { %p205_p3 = por %p204_p2, %p203_p1 }
   0x7   :  { %p206_p4 = pnand %p205_p3, %p199_p0 }
   0x9   :  { %209 = shalt.err (!%p206_p4)
}
   0xa   :  { %s212_s16 = smov [#allocation2]  }
   0xb   :  { %18 = dma.vmem_to_smem %s16_s14, 16, %s212_s16, [#allocation3]  }
   0xc   :  { %210 = dma.done.wait [#allocation3], 16  }
   0xd   :  { %211 = vsyncadd [#allocation3], 4294967280 }
   0xe   :  { %26 = sfence }
   0xf   :  { %v39_v0 = vld [vmem:[%s261_s2] sm:$0xff]  ;;  %v213_v1 = vmov 3   ;;  %v214_v2 = vmov 1   ;;  %v215_v3 = vmov 2   ;;  %v216_v4 = vmov 0   ;;  %s28_s0 = sld [smem:[#allocation2]] }
  0x10   :  { %190 = vset.pattern.permute.xlu0 %v213_v1  ;;  %192 = vset.pattern.permute.xlu1 %v214_v2  ;;  %v217_v5 = vmov 4   ;;  %v218_v6 = vmov 5   ;;  %v219_v7 = vmov 6   ;;  %s247_s2 = sld [smem:[#allocation2 + $0x4]]  ;;  %v27_v8 = vld [vmem:[%s260_s1] sm:$0x3]  ;;  %v42_v12 = vlaneseq }
  0x11   :  { %54 = vperm.xlu0 %190, %v39_v0   ;;  %68 = vperm.xlu1 %192, %v39_v0   ;;  %s178_s19 = sld [smem:[#allocation2 + $0x1]] }
  0x12   :  { %s179_s22 = sld [smem:[#allocation2 + $0x2]]  ;;  %v43_v16 = vshrl.u32 %v42_v12, 7 }
  0x13   :  { %s180_s23 = sld [smem:[#allocation2 + $0x3]] }
  0x14   :  { %v44_v21 = vsub.s32 0, %v43_v16  ;;  %v48_v22 = vsub.s32 1, %v43_v16 }
  0x15   :  { %191 = vset.pattern.permute.xlu0 %v215_v3  ;;  %193 = vset.pattern.permute.xlu1 %v216_v4  ;;  %v30_v9 = vstv %s28_s0 }
  0x16   :  { %60 = vperm.xlu0 %191, %v39_v0   ;;  %76 = vperm.xlu1 %193, %v39_v0   ;;  %v31_v10 = vmax.f32 %v30_v9, %v27_v8  ;;  %v32_v11 = vstv %s247_s2  ;;  %vm34_vm0 = vcmp.ge.f32.partialorder %v27_v8, %v30_v9 }
  0x17   :  { %v82_v13 = vstv %s178_s19  ;;  %vm35_vm1 = vcmp.le.f32.partialorder %v27_v8, %v32_v11 }
  0x18   :  { %v33_v14 = vmin.f32 %v32_v11, %v31_v10  ;;  %v107_v15 = vstv %s179_s22  ;;  %vm36_vm2 = vmand %vm34_vm0, %vm35_vm1 }
  0x19   :  { %v132_v18 = vstv %s180_s23 }
  0x1a   :  { %194 = vset.pattern.permute.xlu1 %v217_v5  ;;  %195 = vset.pattern.permute.xlu0 %v218_v6  ;;  %v83_v17 = vsub.f32 %v33_v14, %v82_v13  ;;  %v108_v19 = vsub.f32 %v33_v14, %v107_v15  ;;  %v133_v20 = vsub.f32 %v33_v14, %v132_v18 }
  0x1b   :  { %88 = vperm.xlu1 %194, %v39_v0   ;;  %113 = vperm.xlu0 %195, %v39_v0   ;;  %v40_v23 = vsub.f32 %v33_v14, %v30_v9 }
  0x1c   :  { %v84_v24 = vmax.f32 %v83_v17, 0.0  ;;  %v109_v25 = vmax.f32 %v108_v19, 0.0  ;;  %v134_v26 = vmax.f32 %v133_v20, 0.0 }
  0x1d   :  { %v45_v28 = vrot.slane %v40_v23, %v44_v21  ;;  %v49_v29 = vrot.slane %v40_v23, %v48_v22 }
  0x1e   :  { %v85_v31 = vmul.f32 %v84_v24, %v84_v24  ;;  %v110_v32 = vmul.f32 %v109_v25, %v109_v25  ;;  %v135_v33 = vmul.f32 %v134_v26, %v134_v26 }
  0x1f   :  { %196 = vset.pattern.permute.xlu1 %v219_v7  ;;  %197 = vset.pattern.permute.xlu0 %v219_v7 }
  0x20   :  { %138 = vperm.xlu1 %196, %v39_v0   ;;  %v86_v36 = vmul.f32 %v85_v31, %v84_v24  ;;  %v111_v41 = vmul.f32 %v110_v32, %v109_v25  ;;  %v136_v42 = vmul.f32 %v135_v33, %v134_v26  ;;  %v220_v0 = vmov 0.0  }
  0x21   :  { %v177_v1 = vsel %vm36_vm2, 1.0, %v220_v0 }
  0x22   :  { %v95_v45 = vrot.slane %v86_v36, %v44_v21  ;;  %v99_v46 = vrot.slane %v86_v36, %v48_v22  ;;  %v120_v50 = vrot.slane %v111_v41, %v44_v21  ;;  %v124_v51 = vrot.slane %v111_v41, %v48_v22 }
  0x23   :  { %v145_v53 = vrot.slane %v136_v42, %v44_v21  ;;  %v149_v54 = vrot.slane %v136_v42, %v48_v22  ;;  %v160_v8 = vrot.slane %v177_v1, %v44_v21  ;;  %v164_v9 = vrot.slane %v177_v1, %v48_v22 }
  0x8c   :  { %v55_v27 = vpop.permute.xlu0 %54  ;;  %v69_v30 = vpop.permute.xlu1 %68 }
  0x8d   :  { %v57_v34 = vmul.f32 %v55_v27, %v45_v28  ;;  %v58_v35 = vmul.f32 %v55_v27, %v49_v29 }
  0x91   :  { %v61_v37 = vpop.permute.xlu0 %60  ;;  %v77_v38 = vpop.permute.xlu1 %76 }
  0x92   :  { %v63_v39 = vadd.f32 %v61_v37, %v57_v34  ;;  %v64_v40 = vadd.f32 %v61_v37, %v58_v35 }
  0x94   :  { %v65_v43 = vmul.f32 %v63_v39, %v45_v28  ;;  %v66_v44 = vmul.f32 %v64_v40, %v49_v29 }
  0x96   :  { %v71_v47 = vadd.f32 %v69_v30, %v65_v43  ;;  %v72_v48 = vadd.f32 %v69_v30, %v66_v44  ;;  %v89_v49 = vpop.permute.xlu1 %88  ;;  %v114_v52 = vpop.permute.xlu0 %113 }
  0x97   :  { %v102_v57 = vmul.f32 %v95_v45, %v89_v49  ;;  %v103_v58 = vmul.f32 %v99_v46, %v89_v49  ;;  %v127_v61 = vmul.f32 %v120_v50, %v114_v52  ;;  %v128_v62 = vmul.f32 %v124_v51, %v114_v52 }
  0x98   :  { %v73_v55 = vmul.f32 %v71_v47, %v45_v28  ;;  %v74_v56 = vmul.f32 %v72_v48, %v49_v29 }
  0x9a   :  { %v79_v59 = vadd.f32 %v77_v38, %v73_v55  ;;  %v80_v60 = vadd.f32 %v77_v38, %v74_v56 }
  0x9b   :  { %v139_v63 = vpop.permute.xlu1 %138 }
  0x9c   :  { %v104_v2 = vadd.f32 %v102_v57, %v79_v59  ;;  %v105_v3 = vadd.f32 %v103_v58, %v80_v60  ;;  %v152_v4 = vmul.f32 %v145_v53, %v139_v63  ;;  %v153_v5 = vmul.f32 %v149_v54, %v139_v63 }
  0x9e   :  { %v129_v6 = vadd.f32 %v127_v61, %v104_v2  ;;  %v130_v7 = vadd.f32 %v128_v62, %v105_v3 }
  0xa0   :  { %v154_v10 = vadd.f32 %v152_v4, %v129_v6  ;;  %v155_v11 = vadd.f32 %v153_v5, %v130_v7 }
  0xa2   :  { %v167_v12 = vmul.f32 %v160_v8, %v154_v10  ;;  %v168_v13 = vmul.f32 %v164_v9, %v155_v11 }
  0xa4   :  { %169 = vst [vmem:[%s262_s3] sm:$0xff] %v167_v12  ;;  %170 = vst [vmem:[%s262_s3 + $0x8] sm:$0xff] %v168_v13 }
  0xa5   :  { %175 = vsyncpa [#allocation3], 1 }

</bundles_post_ra>
